<compile_context>
chip_gen: v6e
topology: v6e:2x2x1
jax: 0.10.0
libtpu: 0.0.40
codegen_flags: <defaults>
</compile_context>

<pallas_src>
import jax
import jax.numpy as jnp
from jax import lax
from jax.experimental import pallas as pl
from jax.experimental.pallas import tpu as pltpu

BN_EPS = 1e-5


def nonlinear_block_kernel(x_ref, wt_ref, gb_ref, o_ref):
    # x_ref:  (N, D_in)        full batch, full input features (native dtype)
    # wt_ref: (D_in, TILE_N)   pre-transposed Linear weight slab (native dtype)
    # gb_ref: (2, TILE_N)      row 0 = gamma, row 1 = beta
    # o_ref:  (N, TILE_N)      output slab
    n = x_ref.shape[0]

    # Linear (no bias): y = x @ W.T, laid out as x @ W_t  -> (N, TILE_N).
    # MXU consumes native dtype, accumulates in f32.
    y = jnp.dot(x_ref[...], wt_ref[...], preferred_element_type=jnp.float32)

    # ReLU (VPU)
    y = jnp.maximum(y, 0.0)

    # BatchNorm1d training-mode stats over the batch axis, single pass:
    # mean = E[y], var = E[y^2] - mean^2 (biased, like PyTorch BN forward).
    inv_n = jnp.float32(1.0 / n)
    sum_y = jnp.sum(y, axis=0, keepdims=True)          # (1, TILE_N)
    sum_yy = jnp.sum(y * y, axis=0, keepdims=True)     # (1, TILE_N)
    mean = sum_y * inv_n
    var = jnp.maximum(sum_yy * inv_n - mean * mean, 0.0)

    gb = gb_ref[...].astype(jnp.float32)               # (2, TILE_N)
    gamma = gb[0:1, :]
    beta = gb[1:2, :]

    # Fused normalize + affine: out = y * scale + bias
    scale = gamma * lax.rsqrt(var + BN_EPS)            # (1, TILE_N)
    bias = beta - mean * scale                         # (1, TILE_N)
    o_ref[...] = (y * scale + bias).astype(o_ref.dtype)


def nonlinear_block(x, weight, gamma, beta, *, tile_n=256):
    """x: (N, D_in); weight: (D_out, D_in) as nn.Linear; gamma/beta: (D_out,)."""
    N, D_in = x.shape
    D_out, _ = weight.shape
    tile_n = min(tile_n, D_out)
    assert D_out % tile_n == 0, "D_out must be a multiple of tile_n"

    # One-time layout prep outside the kernel (cheap XLA ops, not per-grid-step):
    weight_t = weight.T                                  # (D_in, D_out)
    gb = jnp.stack([gamma, beta], axis=0)                # (2, D_out)

    # VMEM working set: x block + double-buffered weight slab + double-buffered
    # output slab + double-buffered gamma/beta slab; 2x headroom + margin.
    isz = jnp.dtype(x.dtype).itemsize
    wsz = jnp.dtype(weight.dtype).itemsize
    working = (N * D_in * isz
               + 2 * D_in * tile_n * wsz
               + 2 * N * tile_n * isz
               + 2 * 2 * tile_n * 4)
    vmem_limit = int(min(max(2 * working + (2 << 20), 16 << 20), 100 << 20))

    grid = (D_out // tile_n,)
    return pl.pallas_call(
        nonlinear_block_kernel,
        out_shape=jax.ShapeDtypeStruct((N, D_out), x.dtype),
        grid_spec=pltpu.PrefetchScalarGridSpec(
            num_scalar_prefetch=0,
            grid=grid,
            in_specs=[
                pl.BlockSpec((N, D_in), lambda j: (0, 0)),        # x: full batch
                pl.BlockSpec((D_in, tile_n), lambda j: (0, j)),   # W_t slab
                pl.BlockSpec((2, tile_n), lambda j: (0, j)),      # [gamma; beta] slab
            ],
            out_specs=pl.BlockSpec((N, tile_n), lambda j: (0, j)),
        ),
        compiler_params=pltpu.CompilerParams(
            dimension_semantics=("parallel",),
            vmem_limit_bytes=vmem_limit,
        ),
    )(x, weight_t, gb)


def nonlinear_block_ref(x, weight, gamma, beta):
    """Pure-JAX reference mirroring PyTorch training-mode forward."""
    y = jnp.maximum(x @ weight.T, 0.0)
    mean = jnp.mean(y, axis=0, keepdims=True)
    var = jnp.mean((y - mean) ** 2, axis=0, keepdims=True)  # biased, like BN
    y_hat = (y - mean) / jnp.sqrt(var + BN_EPS)
    return y_hat * gamma.reshape(1, -1) + beta.reshape(1, -1)


# TODO(synk): PyTorch BatchNorm1d in training mode also updates
# running_mean/running_var buffers; those side-effect updates are not produced here.

if __name__ == "__main__":
    # Small shapes consistent with the module: (batch, input_dim) -> (batch, output_dim)
    N = 8          # batch
    D_IN = 32      # input_dim
    D_OUT = 512    # output_dim (2 grid steps at tile_n=256)
    TILE_N = 256

    key = jax.random.PRNGKey(0)
    kx, kw = jax.random.split(key)

    x = jax.random.normal(kx, (N, D_IN), dtype=jnp.float32)

    # Deterministic parameter init (shapes from __init__):
    #   nn.Linear(D_IN, D_OUT, bias=False).weight : (D_OUT, D_IN)
    bound = 1.0 / jnp.sqrt(jnp.float32(D_IN))
    weight = jax.random.uniform(kw, (D_OUT, D_IN), dtype=jnp.float32,
                                minval=-bound, maxval=bound)
    #   nn.BatchNorm1d(D_OUT): weight (gamma) = 1, bias (beta) = 0
    gamma = jnp.ones((D_OUT,), dtype=jnp.float32)
    beta = jnp.zeros((D_OUT,), dtype=jnp.float32)

    out = nonlinear_block(x, weight, gamma, beta, tile_n=TILE_N)
    out = jax.block_until_ready(out)

    ref = nonlinear_block_ref(x, weight, gamma, beta)
    assert out.shape == (N, D_OUT)
    assert jnp.allclose(out, ref, atol=1e-4, rtol=1e-4), "mismatch vs reference"

    print("KERNEL_OK")
</pallas_src>

<mosaic_0001>
module attributes {stable_mosaic.version = 11 : i64} {
  func.func @nonlinear_block_kernel(%arg0: i32, %arg1: memref<8x32xf32, #tpu.memory_space<vmem>>, %arg2: memref<32x256xf32, #tpu.memory_space<vmem>>, %arg3: memref<2x256xf32, #tpu.memory_space<vmem>>, %arg4: memref<8x256xf32, #tpu.memory_space<vmem>>) attributes {dimension_semantics = [#tpu.dimension_semantics<parallel>], iteration_bounds = array<i64: 2>, scalar_prefetch = 0 : i64, scratch_operands = 0 : i64, tpu.core_type = #tpu.core_type<tc>, window_params = [{pipeline_mode = #tpu.pipeline_mode<synchronous>, transform_indices = @transform_0, window_bounds = array<i64: 8, 32>}, {transform_indices = @transform_1, window_bounds = array<i64: 32, 256>}, {transform_indices = @transform_2, window_bounds = array<i64: 2, 256>}, {transform_indices = @transform_3, window_bounds = array<i64: 8, 256>}]} {
    %c0 = arith.constant 0 : index
    %c0_0 = arith.constant 0 : index
    %0 = vector.load %arg1[%c0, %c0_0] : memref<8x32xf32, #tpu.memory_space<vmem>>, vector<8x32xf32>
    %c0_1 = arith.constant 0 : index
    %c0_2 = arith.constant 0 : index
    %1 = vector.load %arg2[%c0_1, %c0_2] : memref<32x256xf32, #tpu.memory_space<vmem>>, vector<32x256xf32>
    %cst = arith.constant dense<0.000000e+00> : vector<8x256xf32>
    %2 = tpu.matmul %0, %1, %cst {dimension_numbers = #tpu.dot_dimension_numbers<[1], [0], [0], [1], [0, 0, 1, 1], [], []>} : vector<8x32xf32>, vector<32x256xf32>, vector<8x256xf32> -> vector<8x256xf32>
    %cst_3 = arith.constant 0.000000e+00 : f32
    %3 = vector.broadcast %cst_3 : f32 to vector<8x256xf32>
    %4 = arith.maximumf %2, %3 : vector<8x256xf32>
    %cst_4 = arith.constant dense<0.000000e+00> : vector<256xf32>
    %5 = vector.multi_reduction <add>, %4, %cst_4 [0] : vector<8x256xf32> to vector<256xf32>
    %6 = vector.shape_cast %5 : vector<256xf32> to vector<1x256xf32>
    %7 = arith.mulf %4, %4 : vector<8x256xf32>
    %cst_5 = arith.constant dense<0.000000e+00> : vector<256xf32>
    %8 = vector.multi_reduction <add>, %7, %cst_5 [0] : vector<8x256xf32> to vector<256xf32>
    %9 = vector.shape_cast %8 : vector<256xf32> to vector<1x256xf32>
    %cst_6 = arith.constant 1.250000e-01 : f32
    %10 = vector.broadcast %cst_6 : f32 to vector<1x256xf32>
    %11 = arith.mulf %6, %10 : vector<1x256xf32>
    %cst_7 = arith.constant 1.250000e-01 : f32
    %12 = vector.broadcast %cst_7 : f32 to vector<1x256xf32>
    %13 = arith.mulf %9, %12 : vector<1x256xf32>
    %14 = arith.mulf %11, %11 : vector<1x256xf32>
    %15 = arith.subf %13, %14 : vector<1x256xf32>
    %cst_8 = arith.constant 0.000000e+00 : f32
    %16 = vector.broadcast %cst_8 : f32 to vector<1x256xf32>
    %17 = arith.maximumf %15, %16 : vector<1x256xf32>
    %c0_9 = arith.constant 0 : index
    %c0_10 = arith.constant 0 : index
    %18 = vector.load %arg3[%c0_9, %c0_10] : memref<2x256xf32, #tpu.memory_space<vmem>>, vector<2x256xf32>
    %19 = vector.extract_strided_slice %18 {offsets = [0, 0], sizes = [1, 256], strides = [1, 1]} : vector<2x256xf32> to vector<1x256xf32>
    %20 = vector.extract_strided_slice %18 {offsets = [1, 0], sizes = [1, 256], strides = [1, 1]} : vector<2x256xf32> to vector<1x256xf32>
    %cst_11 = arith.constant 9.99999974E-6 : f32
    %21 = vector.broadcast %cst_11 : f32 to vector<1x256xf32>
    %22 = arith.addf %17, %21 : vector<1x256xf32>
    %23 = math.rsqrt %22 : vector<1x256xf32>
    %24 = arith.mulf %19, %23 : vector<1x256xf32>
    %25 = arith.mulf %11, %24 : vector<1x256xf32>
    %26 = arith.subf %20, %25 : vector<1x256xf32>
    %27 = vector.broadcast %24 : vector<1x256xf32> to vector<8x256xf32>
    %28 = arith.mulf %4, %27 : vector<8x256xf32>
    %29 = vector.broadcast %26 : vector<1x256xf32> to vector<8x256xf32>
    %30 = arith.addf %28, %29 : vector<8x256xf32>
    %c0_12 = arith.constant 0 : index
    %c0_13 = arith.constant 0 : index
    %31 = vector.load %arg4[%c0_12, %c0_13] : memref<8x256xf32, #tpu.memory_space<vmem>>, vector<8x256xf32>
    tpu.vector_store %arg4[%c0_12, %c0_13], %30 {strides = array<i32>} : memref<8x256xf32, #tpu.memory_space<vmem>>, vector<8x256xf32>,
    return
  }
  func.func @transform_0(%arg0: i32) -> (i32, i32) {
    %c0_i32 = arith.constant 0 : i32
    %c0_i32_0 = arith.constant 0 : i32
    %c0_i32_1 = arith.constant 0 : i32
    return %c0_i32, %c0_i32_0 : i32, i32
  }
  func.func @transform_1(%arg0: i32) -> (i32, i32) {
    %c0_i32 = arith.constant 0 : i32
    %c0_i32_0 = arith.constant 0 : i32
    return %c0_i32, %arg0 : i32, i32
  }
  func.func @transform_2(%arg0: i32) -> (i32, i32) {
    %c0_i32 = arith.constant 0 : i32
    %c0_i32_0 = arith.constant 0 : i32
    return %c0_i32, %arg0 : i32, i32
  }
  func.func @transform_3(%arg0: i32) -> (i32, i32) {
    %c0_i32 = arith.constant 0 : i32
    %c0_i32_0 = arith.constant 0 : i32
    return %c0_i32, %arg0 : i32, i32
  }
}

</mosaic_0001>

<bundles_post_ra>
// kernel: tpu_custom_call.1
= control target key start
LH: loop header
LB: loop body
LE: loop exit
PB: predicated region body
PF: predicated region fallthrough
CT: control target
= control target key end

     0   :  { %8 = vsyncpa [#allocation3], 0  ;;  %s1054_s0 = inlined_call_operand.hbm [shape: f32[8,32], index: 0, kind: input, shape index: {}]   ;;  %s1055_s1 = inlined_call_operand.hbm [shape: f32[32,512], index: 1, kind: input, shape index: {}]   ;;  %s1056_s2 = inlined_call_operand.hbm [shape: f32[2,512], index: 2, kind: input, shape index: {}]   ;;  %s1057_s3 = inlined_call_operand.hbm [shape: f32[8,512], index: 3, kind: output, shape index: {}]  }
   0x1   :  { %9 = vsyncpa [#allocation6], 0 }
   0x2   :  { %11 = vsyncpa [#allocation6 + $0x1], 0 }
   0x3   :  { %12 = vsyncpa [#allocation4], 0 }
   0x4   :  { %14 = vsyncpa [#allocation4 + $0x1], 0  ;;  %s831_s12 = smov 0   ;;  %s833_s13 = smov 0  }
   0x5   :  { %s835_s14 = smov 0   ;;  %s837_s15 = smov 0  }
   0x6 LB: > { %s852_s16 = sadd.s32 1, %s800_s15   ;;  %s48_s17 = sadd.s32 1, %s796_s14  ;;  %s800_s15 = sphi %s837_s15, %s1077_s15   ;;  %s796_s14 = sphi %s835_s14, %s1076_s14   ;;  %s792_s13 = sphi %s833_s13, %s1075_s13   ;;  %s788_s12 = sphi %s831_s12, %s1074_s12  }
   0x7   : > { %s45_s18 = ssub.s32 %s800_s15, %s852_s16  ;;  %p55_p0 = scmp.ne.s32.totalorder %s796_s14, %s792_s13 }
   0x8   : > { %p46_p1 = scmp.eq.s32.totalorder %s45_s18, 0  ;;  %p56_p2 = scmp.eq.s32.totalorder %s800_s15, 0 }
   0x9   : > { %p605_p4 = scmp.lt.s32.totalorder %s800_s15, 2  ;;  %s148_s20 = sand.u32 1, %s800_s15  }
   0xa   : > { %s863_s19 = scalar_select %p46_p1, %s796_s14, %s48_s17  }
   0xb   : > { %p57_p5 = por %p56_p2, %p55_p0  ;;  %s150_s21 = sand.u32 1, %s796_s14  }
   0xc   : > { %s559_s22 = sshll.u32 %s150_s21, 6  ;;  %s576_s23 = sshll.u32 %s800_s15, 8 }
   0xd   : > { %s876_s26 = scalar_lea.hbm %s1055_s1, %s576_s23  ;;  %s152_s27 = scalar_lea.vmem [#allocation5], %s559_s22 }
   0xe   : > { %s159_s28 = sshll.u32 %s152_s27, 4  ;;  %p878_p6 = pnand %p605_p4, %p57_p5  ;;  %s882_s28 = int_to_ptr.vmem [resolvable:$true] %s159_s28 }
   0xf   : > { %s884_s30 = scalar_lea.sflag [#allocation6], %s148_s20  ;;  %s650_s4 = scalar_lea.hbm %s876_s26, 1024 }
  0x10   : > { %p651_p7 = scmp.ne.s32.totalorder %s876_s26, %s650_s4  ;;  %p1058_p8 = pneg %p878_p6 }
  0x11   : > { %s655_s7 = scalar_lea.hbm %s1055_s1, 2048  ;;  %p656_p11 = scmp.lt.s32.totalorder %s876_s26, %s1055_s1 }
  0x12   : > { %p653_p9 = pnand %p1058_p8, %p651_p7  ;;  %p657_p12 = scmp.lt.s32.totalorder %s655_s7, %s650_s4 }
  0x14   : > { %p654_p10 = pneg %p653_p9  ;;  %p658_p13 = por %p657_p12, %p656_p11 }
  0x16   : > { %p659_p1 = pnand %p658_p13, %p654_p10 }
  0x18   : > { %662 = shalt.err (!%p659_p1)
}
  0x19   : > { %s663_s10 = scalar_lea.vmem %s882_s28, 1024  ;;  %s802_s11 = smov [#allocation5]  }
  0x1a   : > { %p664_p2 = scmp.ne.s32.totalorder %s882_s28, %s663_s10  ;;  %s668_s17 = sshll.u32 %s802_s11, 4  ;;  %s669_s17 = int_to_ptr.vmem [resolvable:$false] %s668_s17 }
  0x1b   : > { %s670_s18 = scalar_lea.vmem %s669_s17, 2048  ;;  %p671_p7 = scmp.lt.s32.totalorder %s882_s28, %s669_s17 }
  0x1c   : > { %p666_p4 = pnand %p664_p2, %p1058_p8  ;;  %p672_p9 = scmp.lt.s32.totalorder %s670_s18, %s663_s10 }
  0x1e   : > { %p667_p5 = pneg %p666_p4  ;;  %p673_p3 = por %p672_p9, %p671_p7 }
  0x20   : > { %p674_p11 = pnand %p673_p3, %p667_p5 }
  0x22   : > { %677 = shalt.err (!%p674_p11)
}
  0x23   : > { %s803_s20 = smov 512   ;;  %s804_s22 = smov 256  }
  0x24   : > { %s805_s23 = smov 16   ;;  %s912_s24 = sadd.s32 4294967295, %s800_s15  }
  0x25   : > { %596 = dma.hbm_to_vmem [thread:$0]  (!%p878_p6), %s876_s26, 1024, %s882_s28, %s884_s30, %s803_s20, %s804_s22, %s805_s23  }
  0x26   : > { %s555_s25 = sadd.s32 4294967294, %s800_s15   ;;  %p61_p3 = scmp.ne.s32.totalorder %s792_s13, %s788_s12 }
  0x27   : > { %p1060_p10 = scmp.eq.s32.totalorder %s912_s24, 0  ;;  %p111_p12 = scmp.eq.s32.totalorder %s912_s24, 1 }
  0x28   : > { %p117_p13 = scmp.eq.s32.totalorder %s555_s25, 1  ;;  %p556_p1 = scmp.ge.s32.totalorder %s800_s15, 1 }
  0x29   : > { %p922_p2 = por %p1060_p10, %p61_p3  ;;  %p929_p4 = por %p111_p12, %p55_p0 }
  0x2a   : > { %p933_p5 = por %p117_p13, %p61_p3  ;;  %p124_p7 = scmp.lt.s32.totalorder %s800_s15, 3 }
  0x2b   : > { %s1063_s27 = scalar_select %p922_p2, 1, 0 }
  0x2c   : > { %s1064_s26 = scalar_select %p929_p4, 1, 0 }
  0x2d   : > { %s1065_s28 = scalar_select %p933_p5, 1, 0 }
  0x2e   : > { %p938_p9 = pnand %p556_p1, %p124_p7  ;;  %s806_s5 = smov [#allocation2]  }
  0x2f   : > { %s137_s6 = sshll.u32 %s806_s5, 4  ;;  %s562_s7 = sshll.u32 %s150_s21, 2  ;;  %s138_s6 = int_to_ptr.vmem [resolvable:$true] %s137_s6 }
  0x30   : > { %p589_p11 = pneg %p938_p9  ;;  %s577_s8 = sshll.u32 %s800_s15, 6 }
  0x31   : > { %s173_s9 = scalar_lea.vmem [#allocation7], %s562_s7  ;;  %s952_s18 = scalar_lea.hbm %s1056_s2, %s577_s8 }
  0x32   : > { %s181_s10 = sshll.u32 %s173_s9, 4  ;;  %p590_p0 = pnand %p589_p11, %p1060_p10  ;;  %s954_s10 = int_to_ptr.vmem [resolvable:$true] %s181_s10 }
  0x33   : > { %s689_s20 = scalar_lea.vmem %s138_s6, 128  ;;  %p697_p7 = scmp.lt.s32.totalorder %s138_s6, %s138_s6 }
  0x34   : > { %p680_p3 = pneg %p590_p0  ;;  %p690_p12 = scmp.ne.s32.totalorder %s138_s6, %s689_s20 }
  0x35   : > { %p698_p8 = scmp.lt.s32.totalorder %s689_s20, %s689_s20 }
  0x36   : > { %p692_p13 = pnand %p690_p12, %p680_p3 }
  0x37   : > { %p699_p5 = por %p698_p8, %p697_p7 }
  0x38   : > { %p693_p1 = pneg %p692_p13 }
  0x3a   : > { %p700_p4 = pnand %p699_p5, %p693_p1 }
  0x3c   : > { %703 = shalt.err (!%p700_p4)
}
  0x3d   : > { %592 = dma.hbm_to_vmem [thread:$0]  (!%p590_p0), %s1054_s0, 128, %s138_s6, [#allocation3]  }
  0x3e   : > { %s704_s23 = scalar_lea.hbm %s952_s18, 64  ;;  %p1067_p10 = pneg %p878_p6 }
  0x3f   : > { %p705_p11 = scmp.ne.s32.totalorder %s952_s18, %s704_s23  ;;  %s709_s7 = scalar_lea.hbm %s1056_s2, 128 }
  0x40   : > { %p710_p8 = scmp.lt.s32.totalorder %s952_s18, %s1056_s2  ;;  %p711_p4 = scmp.lt.s32.totalorder %s709_s7, %s704_s23 }
  0x41   : > { %p707_p2 = pnand %p705_p11, %p1067_p10 }
  0x42   : > { %p712_p5 = por %p711_p4, %p710_p8 }
  0x43   : > { %p708_p3 = pneg %p707_p2 }
  0x45   : > { %p713_p12 = pnand %p712_p5, %p708_p3 }
  0x47   : > { %716 = shalt.err (!%p713_p12)
}
  0x48   : > { %s717_s6 = scalar_lea.vmem %s954_s10, 64  ;;  %s807_s11 = smov [#allocation7]  }
  0x49   : > { %p718_p0 = scmp.ne.s32.totalorder %s954_s10, %s717_s6  ;;  %s722_s17 = sshll.u32 %s807_s11, 4  ;;  %s723_s17 = int_to_ptr.vmem [resolvable:$false] %s722_s17 }
  0x4a   : > { %s724_s20 = scalar_lea.vmem %s723_s17, 128  ;;  %p725_p1 = scmp.lt.s32.totalorder %s954_s10, %s723_s17 }
  0x4b   : > { %p720_p2 = pnand %p718_p0, %p1067_p10  ;;  %p726_p7 = scmp.lt.s32.totalorder %s724_s20, %s717_s6 }
  0x4d   : > { %p721_p13 = pneg %p720_p2  ;;  %p727_p11 = por %p726_p7, %p725_p1 }
  0x4f   : > { %p728_p8 = pnand %p727_p11, %p721_p13 }
  0x51   : > { %731 = shalt.err (!%p728_p8)
}
  0x52   : > { %599 = dma.hbm_to_vmem [thread:$0]  (!%p878_p6), %s952_s18, 64, %s954_s10, %s884_s30  }
  0x53   : > { %190 = sbr.rel (%p938_p9) target bundleno = 373 (0x175), region = 32  ;;  %p1068_p3 = scmp.eq.s32.totalorder (!%p938_p9), %s912_s24, 0 }
  0x58   : > { %775 = dma.done.wait (%p1068_p3), [#allocation3], 128   ;;  %p1069_p4 = pmov %p1068_p3 }
  0x59   : > { %s196_s21 = sand.u32 1, %s912_s24   ;;  %s990_s22 = sand.u32 1, %s792_s13  }
  0x5a   : > { %777 = vsyncadd (%p1069_p4), [#allocation3], 4294967168  ;;  %s567_s29 = sshll.u32 %s990_s22, 6  ;;  %s197_s23 = scalar_lea.sflag [#allocation6], %s196_s21 }
  0x5b   : > { %s200_s25 = scalar_lea.vmem [#allocation5], %s567_s29  ;;  %p1070_p6 = scmp.ne.s32.totalorder %s1063_s27, 0 }
  0x5d   : > { %779 = dma.done.wait (%p1070_p6), %s197_s23, 1088  }
  0x5e   : > { %781 = vsyncadd (%p1070_p6), %s197_s23, 4294966208  ;;  %v808_v0 = vmov 0.0   ;;  %v248_v1 = vld [vmem:[%s200_s25 + $0x38] sm:$0xff]  ;;  %v247_v2 = vld [vmem:[%s200_s25 + $0x30] sm:$0xff]  ;;  %vm249_vm0 = vcmask 261120   ;;  %v373_v54 = vlaneseq  ;;  %s568_s30 = sshll.u32 %s990_s22, 2 }
  0x5f   : > { %317 = vmatprep.mubr.f32.mxu0 %v808_v0  ;;  %v246_v3 = vld [vmem:[%s200_s25 + $0x28] sm:$0xff]  ;;  %277 = vmatprep.subr.mxu0 %v248_v1  ;;  %v245_v4 = vld [vmem:[%s200_s25 + $0x20] sm:$0xff]  ;;  %v244_v5 = vld [vmem:[%s200_s25 + $0x18] sm:$0xff]  ;;  %v809_v52 = vmov 1983009808   ;;  %s209_s27 = scalar_lea.vmem [#allocation7], %s568_s30 }
  0x60   : > { %278 = vmatpush1.msra.mxu0 %v247_v2  ;;  %v243_v6 = vld [vmem:[%s200_s25 + $0x10] sm:$0xff]  ;;  %v242_v7 = vld [vmem:[%s200_s25 + $0x8] sm:$0xff]  ;;  %v241_v8 = vld [vmem:[%s200_s25] sm:$0xff]  ;;  %v371_v53 = vunpack.c.l.s4 %v809_v52  ;;  %v374_v56 = vshrl.u32 %v373_v54, 7  ;;  %s569_s4 = sshll.u32 %s990_s22, 4  ;;  %s578_s10 = sshll.u32 %s912_s24, 8 }
  0x61   : > { %279 = vmatprep.subr.mxu0 %v246_v3  ;;  %v240_v9 = vld [vmem:[#allocation2] sm:$0xff]  ;;  %v362_v61 = vld [vmem:[%s209_s27] sm:$0xf]  ;;  %s236_s18 = scalar_lea.vmem [#allocation8], %s569_s4  ;;  %s1017_s9 = scalar_lea.hbm %s1057_s3, %s578_s10 }
  0x62   : > { %280 = vmatpush1.msra.mxu0 %v245_v4  ;;  %v372_v55 = vunpack.c.0.s8 %v371_v53  ;;  %v382_v63 = vsub.s32 0, %v374_v56  ;;  %v386_v0 = vsub.s32 2, %v374_v56  ;;  %s453_s5 = sshll.u32 %s236_s18, 4  ;;  %s439_s24 = scalar_lea.sflag [#allocation4], %s990_s22  ;;  %s454_s5 = int_to_ptr.vmem [resolvable:$true] %s453_s5 }
  0x63   : > { %281 = vmatprep.subr.mxu0 %v244_v5  ;;  %s732_s6 = scalar_lea.vmem %s454_s5, 256  ;;  %p1071_p5 = scmp.ne.s32.totalorder %s1064_s26, 0 }
  0x64   : > { %282 = vmatpush1.msra.mxu0 %v243_v6  ;;  %v375_v58 = vsub.s32 %v372_v55, %v374_v56  ;;  %p733_p9 = scmp.ne.s32.totalorder %s454_s5, %s732_s6  ;;  %s810_s11 = smov [#allocation8]  }
  0x65   : > { %283 = vmatprep.subr.mxu0 %v242_v7  ;;  %s736_s17 = sshll.u32 %s810_s11, 4  ;;  %s737_s17 = int_to_ptr.vmem [resolvable:$false] %s736_s17 }
  0x66   : > { %284 = vmatpush1.msra.mxu0 %v241_v8  ;;  %p734_p12 = pnand %p733_p9, %p1071_p5  ;;  %s738_s20 = scalar_lea.vmem %s737_s17, 512 }
  0x67   : > { %570 = vmatmul.mubr.msk.f32.vlgmr.msra.gmra.mxu0 %vm249_vm0, %v240_v9  ;;  %v418_v9 = vsub.s32 1, %v374_v56  ;;  %p739_p10 = scmp.lt.s32.totalorder %s454_s5, %s737_s17  ;;  %p740_p2 = scmp.lt.s32.totalorder %s738_s20, %s732_s6 }
  0x68   : > { %p735_p0 = pneg %p734_p12 }
  0x69   : > { %p741_p13 = por %p740_p2, %p739_p10 }
  0x6b   : > { %p742_p1 = pnand %p741_p13, %p735_p0 }
 0x127   : > { %v319_v10 = vpop.f32.mrf.mxu0 }
 0x128   : > { %v997_v11 = vmax.f32 %v319_v10, 0.0  ;;  %v422_v10 = vsub.s32 3, %v374_v56 }
 0x129   : > { %v321_v12 = vpop.f32.mrf.mxu0 }
 0x12a   : > { %v326_v13 = vrot.slane %v997_v11, 4  ;;  %v338_v14 = vmul.f32 %v997_v11, %v997_v11  ;;  %v1002_v15 = vmax.f32 %v321_v12, 0.0 }
 0x12c   : > { %v327_v16 = vadd.f32 %v326_v13, %v997_v11  ;;  %v340_v17 = vrot.slane %v338_v14, 4  ;;  %v332_v18 = vrot.slane %v1002_v15, 4  ;;  %v339_v19 = vmul.f32 %v1002_v15, %v1002_v15 }
 0x12e   : > { %v328_v20 = vrot.slane %v327_v16, 2  ;;  %v341_v21 = vadd.f32 %v340_v17, %v338_v14  ;;  %v333_v22 = vadd.f32 %v332_v18, %v1002_v15  ;;  %v346_v23 = vrot.slane %v339_v19, 4 }
 0x130   : > { %v329_v24 = vadd.f32 %v328_v20, %v327_v16  ;;  %v342_v25 = vrot.slane %v341_v21, 2  ;;  %v334_v26 = vrot.slane %v333_v22, 2  ;;  %v347_v27 = vadd.f32 %v346_v23, %v339_v19 }
 0x132   : > { %v330_v28 = vrot.slane %v329_v24, 1  ;;  %v343_v29 = vadd.f32 %v342_v25, %v341_v21  ;;  %v335_v30 = vadd.f32 %v334_v26, %v333_v22  ;;  %v348_v31 = vrot.slane %v347_v27, 2 }
 0x134   : > { %v331_v32 = vadd.f32 %v330_v28, %v329_v24  ;;  %v344_v33 = vrot.slane %v343_v29, 1  ;;  %v336_v34 = vrot.slane %v335_v30, 1  ;;  %v349_v35 = vadd.f32 %v348_v31, %v347_v27 }
 0x136   : > { %v345_v36 = vadd.f32 %v344_v33, %v343_v29  ;;  %v352_v37 = vmul.f32 0.125, %v331_v32  ;;  %v337_v38 = vadd.f32 %v336_v34, %v335_v30  ;;  %v350_v39 = vrot.slane %v349_v35, 1 }
 0x138   : > { %v354_v40 = vmul.f32 0.125, %v345_v36  ;;  %v356_v41 = vmul.f32 %v352_v37, %v352_v37  ;;  %v351_v42 = vadd.f32 %v350_v39, %v349_v35  ;;  %v353_v43 = vmul.f32 0.125, %v337_v38 }
 0x13a   : > { %v358_v44 = vsub.f32 %v354_v40, %v356_v41  ;;  %v355_v45 = vmul.f32 0.125, %v351_v42  ;;  %v357_v46 = vmul.f32 %v353_v43, %v353_v43 }
 0x13c   : > { %v360_v47 = vmax.f32 %v358_v44, 0.0  ;;  %v359_v48 = vsub.f32 %v355_v45, %v357_v46 }
 0x13e   : > { %v363_v49 = vadd.f32 1e-05, %v360_v47  ;;  %v361_v50 = vmax.f32 %v359_v48, 0.0 }
 0x140   : > { %v364_v51 = vadd.f32 1e-05, %v361_v50  ;;  %646 = vrsqrt.f32 %v363_v49 }
 0x142   : > { %648 = vrsqrt.f32 %v364_v51 }
 0x14d   : > { %v647_v57 = vpop.eup %646 }
 0x14f   : > { %v649_v59 = vpop.eup %648 }
 0x150   : > { %v369_v60 = vcombine.low %v647_v57, %v649_v59 }
 0x152   : > { %v376_v62 = vrot.slane %v369_v60, %v375_v58 }
 0x154   : > { %v378_v1 = vmul.f32 %v376_v62, %v362_v61 }
 0x156   : > { %v383_v2 = vrot.slane %v378_v1, %v382_v63  ;;  %v387_v3 = vrot.slane %v378_v1, %v386_v0 }
 0x158   : > { %v390_v4 = vmul.f32 %v383_v2, %v352_v37  ;;  %v391_v5 = vmul.f32 %v387_v3, %v353_v43  ;;  %v412_v13 = vrot.slane %v387_v3, %v382_v63  ;;  %v408_v14 = vrot.slane %v383_v2, %v382_v63 }
 0x15a   : > { %v394_v6 = vcombine.low %v390_v4, %v391_v5  ;;  %v414_v18 = vmul.f32 %v412_v13, %v1002_v15  ;;  %v413_v20 = vmul.f32 %v408_v14, %v997_v11 }
 0x15c   : > { %v401_v7 = vrot.slane %v394_v6, %v375_v58 }
 0x15e   : > { %v402_v8 = vrot.slane %v401_v7, 7 }
 0x160   : > { %v404_v12 = vsub.f32 %v362_v61, %v402_v8 }
 0x162   : > { %v423_v16 = vrot.slane %v404_v12, %v422_v10  ;;  %v419_v17 = vrot.slane %v404_v12, %v418_v9 }
 0x164   : > { %v433_v19 = vrot.slane %v423_v16, %v418_v9  ;;  %v429_v21 = vrot.slane %v419_v17, %v418_v9 }
 0x166   : > { %v435_v22 = vadd.f32 %v433_v19, %v414_v18  ;;  %v434_v23 = vadd.f32 %v429_v21, %v413_v20 }
 0x168   : > { %436 = vst [vmem:[%s236_s18] sm:$0xff] %v434_v23  ;;  %437 = vst [vmem:[%s236_s18 + $0x8] sm:$0xff] %v435_v22 }
 0x169   : > { %745 = shalt.err (!%p742_p1)
}
 0x16a   : > { %s746_s21 = scalar_lea.hbm %s1017_s9, 256  ;;  %s750_s23 = scalar_lea.hbm %s1057_s3, 512 }
 0x16b   : > { %p747_p7 = scmp.ne.s32.totalorder %s1017_s9, %s746_s21  ;;  %p751_p3 = scmp.lt.s32.totalorder %s1017_s9, %s1057_s3 }
 0x16c   : > { %p752_p4 = scmp.lt.s32.totalorder %s750_s23, %s746_s21 }
 0x16d   : > { %p748_p11 = pnand %p747_p7, %p1071_p5 }
 0x16e   : > { %p753_p6 = por %p752_p4, %p751_p3 }
 0x16f   : > { %p749_p8 = pneg %p748_p11 }
 0x171   : > { %p754_p9 = pnand %p753_p6, %p749_p8 }
 0x173   : > { %757 = shalt.err (!%p754_p9)
}
 0x174   : > { %587 = dma.vmem_to_hbm [thread:$0]  (%p1071_p5), %s454_s5, 256, %s1017_s9, %s439_s24  }
 0x175 PF: > { %s465_s27 = sand.u32 1, %s788_s12   ;;  %p1072_p12 = scmp.ne.s32.totalorder %s1065_s28, 0 }
 0x176   : > { %p1073_p0 = scmp.ge.s32.totalorder %s800_s15, 2  ;;  %s466_s4 = scalar_lea.sflag [#allocation4], %s465_s27 }
 0x178   : > { %p601_p10 = pnand %p1073_p0, %p1072_p12 }
 0x17a   : > { %p602_p2 = pneg %p601_p10 }
 0x17c   : > { %783 = dma.done.wait (%p602_p2), %s466_s4, 256  }
 0x17d   : > { %785 = vsyncadd (%p602_p2), %s466_s4, 4294967040  ;;  %p17_p13 = scmp.ge.s32.totalorder %s852_s16, 4   ;;  %s1074_s12 = smov %s792_s13 }
 0x17e   : > { %s1075_s13 = smov %s796_s14  ;;  %s1076_s14 = smov %s863_s19 }
 0x17f   : > { %s1077_s15 = smov %s852_s16  ;;  %19 = sbr.rel (!%p17_p13) target bundleno = 6 (0x6), region = 93 }
 0x184   :  { %471 = vsyncpa [#allocation3], 1 }
 0x185   :  { %473 = vsyncpa [#allocation3 + $0x1], 1 }
 0x186   :  { %474 = vsyncpa [#allocation6], 1 }
 0x187   :  { %476 = vsyncpa [#allocation6 + $0x1], 1 }
 0x188   :  { %477 = vsyncpa [#allocation4], 1 }
 0x189   :  { %479 = vsyncpa [#allocation4 + $0x1], 1 }

</bundles_post_ra>
